<compile_context>
chip_gen: v7x
topology: tpu7x:2x2x1
jax: 0.10.0
libtpu: 0.0.40
codegen_flags: <defaults>
</compile_context>

<pallas_src>
import functools

import jax
import jax.numpy as jnp
from jax.experimental import pallas as pl
from jax.experimental.pallas import tpu as pltpu


def _round_up(x: int, m: int) -> int:
    return ((x + m - 1) // m) * m


def _fused_heads_kernel(*refs, layer_counts, sigmoid_flags, use_scratch):
    """Fused multi-head MLP over one [tile_m, K] row-tile.

    refs = (x_ref,
            w/b refs for head 0 layer 0..L0-1, w/b refs for head 1 ...,
            out_ref per head,
            [hidden scratch per head, only if use_scratch])
    """
    n_heads = len(layer_counts)
    n_params = sum(layer_counts)
    x_ref = refs[0]
    wb = refs[1:1 + 2 * n_params]
    outs = refs[1 + 2 * n_params:1 + 2 * n_params + n_heads]
    scratches = refs[1 + 2 * n_params + n_heads:]

    # In-kernel bf16 cast: free VPU work hidden under the MXU pushes, and the
    # activations cross HBM exactly once (as f32, no wrapper cast pass).
    x = x_ref[...].astype(jnp.bfloat16)

    p = 0
    for head in range(n_heads):
        nl = layer_counts[head]
        h = x
        for i in range(nl):
            w_ref = wb[2 * (p + i)]
            b_ref = wb[2 * (p + i) + 1]
            # MXU matmul with f32 accumulation; bias / ReLU / sigmoid on the
            # f32 accumulator (VPU / EUP slots).
            y = jnp.dot(h, w_ref[...], preferred_element_type=jnp.float32)
            y = y + b_ref[...]
            if i < nl - 1:
                y = jnp.maximum(y, 0.0)
                if use_scratch:
                    h_ref = scratches[head]
                    h_ref[...] = y.astype(jnp.bfloat16)  # stays in VMEM
                    h = h_ref[...]
                else:
                    h = y.astype(jnp.bfloat16)
            else:
                if sigmoid_flags[head]:
                    y = jax.nn.sigmoid(y)
                outs[head][...] = y.astype(outs[head].dtype)  # lane-dense bf16
        p += nl


def init_mlp_params(key, input_dim, hidden_dim, output_dim, num_layers,
                    dtype=jnp.float32):
    """Deterministic nn.Linear-style init (uniform(-1/sqrt(fan_in), +))."""
    h = [hidden_dim] * (num_layers - 1)
    dims_in = [input_dim] + h
    dims_out = h + [output_dim]
    params = []
    for i, (n_in, n_out) in enumerate(zip(dims_in, dims_out)):
        kw, kb = jax.random.split(jax.random.fold_in(key, i))
        bound = 1.0 / jnp.sqrt(jnp.asarray(n_in, dtype))
        # Stored already transposed to [in, out] for x @ W layout.
        w = jax.random.uniform(kw, (n_in, n_out), dtype, -bound, bound)
        b = jax.random.uniform(kb, (n_out,), dtype, -bound, bound)
        params.append((w, b))
    return params


def fused_mlp_heads(hs, heads, sigmoid_flags, *, tile_m: int = 1024,
                    out_dtype=jnp.bfloat16):
    """Run several MLP heads (PyTorch MLP.forward semantics: ReLU on all but
    the last layer, optional fused final sigmoid) over the same input in ONE
    pallas_call.

    hs: [..., input_dim] -> tuple of [..., out_dim_h] arrays (dtype out_dtype).
    """
    heads = tuple(heads)
    sigmoid_flags = tuple(bool(s) for s in sigmoid_flags)
    assert len(heads) == len(sigmoid_flags)

    orig_shape = hs.shape
    K = orig_shape[-1]
    x2d = hs.reshape(-1, K)              # no cast, no pad: kernel handles both
    M = x2d.shape[0]
    in_bytes = x2d.dtype.itemsize
    out_bytes = jnp.dtype(out_dtype).itemsize

    # Row tiling: big tiles amortize the ~0.35us/step pipeline overhead, but
    # cap so the "parallel" grid has >= 2 steps (keeps both v7x TCs busy).
    cap = _round_up(pl.cdiv(M, 2), 16)
    tile_m = _round_up(max(16, min(int(tile_m), cap)), 16)
    grid = (pl.cdiv(M, tile_m),)
    use_scratch = tile_m > 128

    flat_args = [x2d]
    in_specs = [pl.BlockSpec((tile_m, K), lambda i: (i, 0))]
    out_shapes, out_specs, scratch_shapes = [], [], []
    layer_counts, out_dims, n_pads, hiddens = [], [], [], []

    flops = 0
    transcendentals = 0
    param_bytes = 0
    for head_idx, params in enumerate(heads):
        nl = len(params)
        layer_counts.append(nl)
        out_dim = params[-1][0].shape[1]
        n_pad = _round_up(out_dim, 128)          # lane-dense (unmasked) store
        out_dims.append(out_dim)
        n_pads.append(n_pad)
        hid = params[0][0].shape[1] if nl > 1 else out_dim
        hiddens.append(hid)
        for li, (w, b) in enumerate(params):
            n_in, n_out = w.shape
            flops += 2 * M * n_in * n_out
            wq = w.astype(jnp.bfloat16)
            bq = b.astype(jnp.float32).reshape(1, n_out)
            if li == nl - 1 and n_out != n_pad:
                wq = jnp.pad(wq, ((0, 0), (0, n_pad - n_out)))
                bq = jnp.pad(bq, ((0, 0), (0, n_pad - n_out)))
                n_out = n_pad
            param_bytes += wq.size * 2 + bq.size * 4
            flat_args.append(wq)
            flat_args.append(bq)
            # Constant index_map: weights/biases stay resident in VMEM.
            in_specs.append(pl.BlockSpec((n_in, n_out), lambda i: (0, 0)))
            in_specs.append(pl.BlockSpec((1, n_out), lambda i: (0, 0)))
        if sigmoid_flags[head_idx]:
            transcendentals += M * out_dim
        out_shapes.append(jax.ShapeDtypeStruct((M, n_pad), out_dtype))
        out_specs.append(pl.BlockSpec((tile_m, n_pad), lambda i: (i, 0)))
        if use_scratch:
            scratch_shapes.append(pltpu.VMEM((tile_m, hid), jnp.bfloat16))

    bytes_accessed = (M * K * in_bytes + param_bytes
                      + sum(M * n_pad * out_bytes for n_pad in n_pads))

    # Explicit scoped-VMEM budget: v5e's default is only 16 MiB; cap at the
    # v7x 64 MiB physical VMEM.
    vmem_need = (2 * tile_m * K * in_bytes
                 + sum(2 * tile_m * n_pad * out_bytes for n_pad in n_pads)
                 + 2 * param_bytes
                 + (sum(tile_m * h * 2 for h in hiddens) if use_scratch else 0))
    vmem_limit = int(min(64 * 1024 * 1024,
                         max(32 * 1024 * 1024, 2 * vmem_need)))

    kernel = functools.partial(
        _fused_heads_kernel,
        layer_counts=tuple(layer_counts),
        sigmoid_flags=sigmoid_flags,
        use_scratch=use_scratch,
    )

    outs = pl.pallas_call(
        kernel,
        out_shape=tuple(out_shapes),
        grid_spec=pltpu.PrefetchScalarGridSpec(
            num_scalar_prefetch=0,
            grid=grid,
            in_specs=in_specs,
            out_specs=tuple(out_specs),
            scratch_shapes=scratch_shapes,
        ),
        compiler_params=pltpu.CompilerParams(
            dimension_semantics=("parallel",),   # shard rows across TCs on v7x
            vmem_limit_bytes=vmem_limit,
        ),
        cost_estimate=pl.CostEstimate(
            flops=flops,
            transcendentals=transcendentals,
            bytes_accessed=bytes_accessed,
        ),
    )(*flat_args)

    results = []
    for out, od in zip(outs, out_dims):
        results.append(out[:, :od].reshape(orig_shape[:-1] + (od,)))
    return tuple(results)


def swin_transt_heads(hs, cls_params, box_params, *, tile_m: int = 1024):
    """outputs_class = class_embed(hs); outputs_coord = bbox_embed(hs).sigmoid()
    — both heads fused into one kernel launch (shared hs read)."""
    return fused_mlp_heads(hs, (cls_params, box_params), (False, True),
                           tile_m=tile_m)


def _mlp_reference(params, x, final_sigmoid=False, out_dtype=jnp.bfloat16):
    """Pure-JAX reference following the same bf16-input / f32-accum path."""
    num_layers = len(params)
    shape = x.shape
    out_dim = params[-1][0].shape[1]
    h = x.reshape(-1, shape[-1]).astype(jnp.bfloat16)
    for i, (w, b) in enumerate(params):
        y = jnp.dot(h, w.astype(jnp.bfloat16),
                    preferred_element_type=jnp.float32) + b.astype(jnp.float32)
        if i < num_layers - 1:
            h = jnp.maximum(y, 0.0).astype(jnp.bfloat16)
        else:
            y = jax.nn.sigmoid(y) if final_sigmoid else y
            h = y.astype(out_dtype)
    return h.reshape(shape[:-1] + (out_dim,))


if __name__ == "__main__":
    key = jax.random.PRNGKey(0)
    k_hs, k_cls, k_box, k_hs2 = jax.random.split(key, 4)

    # `hs` from the feature-fusion network after flatten(2).permute(0,2,1)
    # .unsqueeze(0): [1, batch, num_vectors, d_model].  Small test shapes.
    batch, num_vectors, d_model, num_classes = 2, 64, 32, 1
    hs = jax.random.normal(k_hs, (1, batch, num_vectors, d_model), jnp.float32)

    cls_params = init_mlp_params(k_cls, d_model, d_model, num_classes + 1, 3)
    box_params = init_mlp_params(k_box, d_model, d_model, 4, 3)

    # Fused heads: one pallas_call produces both logits and (sigmoid'd) boxes.
    pred_logits, pred_boxes = swin_transt_heads(hs, cls_params, box_params)
    pred_logits, pred_boxes = jax.block_until_ready((pred_logits, pred_boxes))

    out = {"pred_logits": pred_logits[-1], "pred_boxes": pred_boxes[-1]}

    ref_logits = _mlp_reference(cls_params, hs)
    ref_boxes = _mlp_reference(box_params, hs, final_sigmoid=True)

    assert out["pred_logits"].shape == (batch, num_vectors, num_classes + 1)
    assert out["pred_boxes"].shape == (batch, num_vectors, 4)
    assert jnp.allclose(pred_logits.astype(jnp.float32),
                        ref_logits.astype(jnp.float32), atol=1e-2, rtol=1e-2)
    assert jnp.allclose(pred_boxes.astype(jnp.float32),
                        ref_boxes.astype(jnp.float32), atol=1e-2, rtol=1e-2)
    assert bool(jnp.all((out["pred_boxes"] >= 0) & (out["pred_boxes"] <= 1)))

    # Second config: M not divisible by tile_m (partial trailing block) and the
    # large-tile path with the VMEM hidden-activation scratch.
    nv2 = 300
    hs2 = jax.random.normal(k_hs2, (1, batch, nv2, d_model), jnp.float32)
    pl2, pb2 = swin_transt_heads(hs2, cls_params, box_params)
    pl2, pb2 = jax.block_until_ready((pl2, pb2))
    assert pl2.shape == (1, batch, nv2, num_classes + 1)
    assert pb2.shape == (1, batch, nv2, 4)
    assert jnp.allclose(pl2.astype(jnp.float32),
                        _mlp_reference(cls_params, hs2).astype(jnp.float32),
                        atol=1e-2, rtol=1e-2)
    assert jnp.allclose(pb2.astype(jnp.float32),
                        _mlp_reference(box_params, hs2,
                                       final_sigmoid=True).astype(jnp.float32),
                        atol=1e-2, rtol=1e-2)
    assert bool(jnp.all((pb2 >= 0) & (pb2 <= 1)))

    print("KERNEL_OK")
</pallas_src>

<mosaic_0001>
module attributes {stable_mosaic.version = 11 : i64} {
  func.func @_fused_heads_kernel(%arg0: i32, %arg1: memref<64x32xf32, #tpu.memory_space<vmem>>, %arg2: memref<32x32xbf16, #tpu.memory_space<vmem>>, %arg3: memref<1x32xf32, #tpu.memory_space<vmem>>, %arg4: memref<32x32xbf16, #tpu.memory_space<vmem>>, %arg5: memref<1x32xf32, #tpu.memory_space<vmem>>, %arg6: memref<32x128xbf16, #tpu.memory_space<vmem>>, %arg7: memref<1x128xf32, #tpu.memory_space<vmem>>, %arg8: memref<32x32xbf16, #tpu.memory_space<vmem>>, %arg9: memref<1x32xf32, #tpu.memory_space<vmem>>, %arg10: memref<32x32xbf16, #tpu.memory_space<vmem>>, %arg11: memref<1x32xf32, #tpu.memory_space<vmem>>, %arg12: memref<32x128xbf16, #tpu.memory_space<vmem>>, %arg13: memref<1x128xf32, #tpu.memory_space<vmem>>, %arg14: memref<64x128xbf16, #tpu.memory_space<vmem>>, %arg15: memref<64x128xbf16, #tpu.memory_space<vmem>>) attributes {dimension_semantics = [#tpu.dimension_semantics<parallel>], iteration_bounds = array<i64: 2>, scalar_prefetch = 0 : i64, scratch_operands = 0 : i64, tpu.core_type = #tpu.core_type<tc>, window_params = [{transform_indices = @transform_0, window_bounds = array<i64: 64, 32>}, {pipeline_mode = #tpu.pipeline_mode<synchronous>, transform_indices = @transform_1, window_bounds = array<i64: 32, 32>}, {pipeline_mode = #tpu.pipeline_mode<synchronous>, transform_indices = @transform_2, window_bounds = array<i64: 1, 32>}, {pipeline_mode = #tpu.pipeline_mode<synchronous>, transform_indices = @transform_3, window_bounds = array<i64: 32, 32>}, {pipeline_mode = #tpu.pipeline_mode<synchronous>, transform_indices = @transform_4, window_bounds = array<i64: 1, 32>}, {pipeline_mode = #tpu.pipeline_mode<synchronous>, transform_indices = @transform_5, window_bounds = array<i64: 32, 128>}, {pipeline_mode = #tpu.pipeline_mode<synchronous>, transform_indices = @transform_6, window_bounds = array<i64: 1, 128>}, {pipeline_mode = #tpu.pipeline_mode<synchronous>, transform_indices = @transform_7, window_bounds = array<i64: 32, 32>}, {pipeline_mode = #tpu.pipeline_mode<synchronous>, transform_indices = @transform_8, window_bounds = array<i64: 1, 32>}, {pipeline_mode = #tpu.pipeline_mode<synchronous>, transform_indices = @transform_9, window_bounds = array<i64: 32, 32>}, {pipeline_mode = #tpu.pipeline_mode<synchronous>, transform_indices = @transform_10, window_bounds = array<i64: 1, 32>}, {pipeline_mode = #tpu.pipeline_mode<synchronous>, transform_indices = @transform_11, window_bounds = array<i64: 32, 128>}, {pipeline_mode = #tpu.pipeline_mode<synchronous>, transform_indices = @transform_12, window_bounds = array<i64: 1, 128>}, {transform_indices = @transform_13, window_bounds = array<i64: 64, 128>}, {transform_indices = @transform_14, window_bounds = array<i64: 64, 128>}]} {
    %c0 = arith.constant 0 : index
    %c0_0 = arith.constant 0 : index
    %0 = vector.load %arg1[%c0, %c0_0] : memref<64x32xf32, #tpu.memory_space<vmem>>, vector<64x32xf32>
    %1 = arith.truncf %0 : vector<64x32xf32> to vector<64x32xbf16>
    %c0_1 = arith.constant 0 : index
    %c0_2 = arith.constant 0 : index
    %2 = vector.load %arg2[%c0_1, %c0_2] : memref<32x32xbf16, #tpu.memory_space<vmem>>, vector<32x32xbf16>
    %cst = arith.constant dense<0.000000e+00> : vector<64x32xf32>
    %3 = tpu.matmul %1, %2, %cst {dimension_numbers = #tpu.dot_dimension_numbers<[1], [0], [0], [1], [0, 0, 1, 1], [], []>} : vector<64x32xbf16>, vector<32x32xbf16>, vector<64x32xf32> -> vector<64x32xf32>
    %c0_3 = arith.constant 0 : index
    %c0_4 = arith.constant 0 : index
    %4 = vector.load %arg3[%c0_3, %c0_4] : memref<1x32xf32, #tpu.memory_space<vmem>>, vector<1x32xf32>
    %5 = vector.broadcast %4 : vector<1x32xf32> to vector<64x32xf32>
    %6 = arith.addf %3, %5 : vector<64x32xf32>
    %cst_5 = arith.constant 0.000000e+00 : f32
    %7 = vector.broadcast %cst_5 : f32 to vector<64x32xf32>
    %8 = arith.maximumf %6, %7 : vector<64x32xf32>
    %9 = arith.truncf %8 : vector<64x32xf32> to vector<64x32xbf16>
    %c0_6 = arith.constant 0 : index
    %c0_7 = arith.constant 0 : index
    %10 = vector.load %arg4[%c0_6, %c0_7] : memref<32x32xbf16, #tpu.memory_space<vmem>>, vector<32x32xbf16>
    %cst_8 = arith.constant dense<0.000000e+00> : vector<64x32xf32>
    %11 = tpu.matmul %9, %10, %cst_8 {dimension_numbers = #tpu.dot_dimension_numbers<[1], [0], [0], [1], [0, 0, 1, 1], [], []>} : vector<64x32xbf16>, vector<32x32xbf16>, vector<64x32xf32> -> vector<64x32xf32>
    %c0_9 = arith.constant 0 : index
    %c0_10 = arith.constant 0 : index
    %12 = vector.load %arg5[%c0_9, %c0_10] : memref<1x32xf32, #tpu.memory_space<vmem>>, vector<1x32xf32>
    %13 = vector.broadcast %12 : vector<1x32xf32> to vector<64x32xf32>
    %14 = arith.addf %11, %13 : vector<64x32xf32>
    %cst_11 = arith.constant 0.000000e+00 : f32
    %15 = vector.broadcast %cst_11 : f32 to vector<64x32xf32>
    %16 = arith.maximumf %14, %15 : vector<64x32xf32>
    %17 = arith.truncf %16 : vector<64x32xf32> to vector<64x32xbf16>
    %c0_12 = arith.constant 0 : index
    %c0_13 = arith.constant 0 : index
    %18 = vector.load %arg6[%c0_12, %c0_13] : memref<32x128xbf16, #tpu.memory_space<vmem>>, vector<32x128xbf16>
    %cst_14 = arith.constant dense<0.000000e+00> : vector<64x128xf32>
    %19 = tpu.matmul %17, %18, %cst_14 {dimension_numbers = #tpu.dot_dimension_numbers<[1], [0], [0], [1], [0, 0, 1, 1], [], []>} : vector<64x32xbf16>, vector<32x128xbf16>, vector<64x128xf32> -> vector<64x128xf32>
    %c0_15 = arith.constant 0 : index
    %c0_16 = arith.constant 0 : index
    %20 = vector.load %arg7[%c0_15, %c0_16] : memref<1x128xf32, #tpu.memory_space<vmem>>, vector<1x128xf32>
    %21 = vector.broadcast %20 : vector<1x128xf32> to vector<64x128xf32>
    %22 = arith.addf %19, %21 : vector<64x128xf32>
    %23 = arith.truncf %22 : vector<64x128xf32> to vector<64x128xbf16>
    %c0_17 = arith.constant 0 : index
    %c0_18 = arith.constant 0 : index
    %24 = vector.load %arg14[%c0_17, %c0_18] : memref<64x128xbf16, #tpu.memory_space<vmem>>, vector<64x128xbf16>
    tpu.vector_store %arg14[%c0_17, %c0_18], %23 {strides = array<i32>} : memref<64x128xbf16, #tpu.memory_space<vmem>>, vector<64x128xbf16>,
    %c0_19 = arith.constant 0 : index
    %c0_20 = arith.constant 0 : index
    %25 = vector.load %arg8[%c0_19, %c0_20] : memref<32x32xbf16, #tpu.memory_space<vmem>>, vector<32x32xbf16>
    %cst_21 = arith.constant dense<0.000000e+00> : vector<64x32xf32>
    %26 = tpu.matmul %1, %25, %cst_21 {dimension_numbers = #tpu.dot_dimension_numbers<[1], [0], [0], [1], [0, 0, 1, 1], [], []>} : vector<64x32xbf16>, vector<32x32xbf16>, vector<64x32xf32> -> vector<64x32xf32>
    %c0_22 = arith.constant 0 : index
    %c0_23 = arith.constant 0 : index
    %27 = vector.load %arg9[%c0_22, %c0_23] : memref<1x32xf32, #tpu.memory_space<vmem>>, vector<1x32xf32>
    %28 = vector.broadcast %27 : vector<1x32xf32> to vector<64x32xf32>
    %29 = arith.addf %26, %28 : vector<64x32xf32>
    %cst_24 = arith.constant 0.000000e+00 : f32
    %30 = vector.broadcast %cst_24 : f32 to vector<64x32xf32>
    %31 = arith.maximumf %29, %30 : vector<64x32xf32>
    %32 = arith.truncf %31 : vector<64x32xf32> to vector<64x32xbf16>
    %c0_25 = arith.constant 0 : index
    %c0_26 = arith.constant 0 : index
    %33 = vector.load %arg10[%c0_25, %c0_26] : memref<32x32xbf16, #tpu.memory_space<vmem>>, vector<32x32xbf16>
    %cst_27 = arith.constant dense<0.000000e+00> : vector<64x32xf32>
    %34 = tpu.matmul %32, %33, %cst_27 {dimension_numbers = #tpu.dot_dimension_numbers<[1], [0], [0], [1], [0, 0, 1, 1], [], []>} : vector<64x32xbf16>, vector<32x32xbf16>, vector<64x32xf32> -> vector<64x32xf32>
    %c0_28 = arith.constant 0 : index
    %c0_29 = arith.constant 0 : index
    %35 = vector.load %arg11[%c0_28, %c0_29] : memref<1x32xf32, #tpu.memory_space<vmem>>, vector<1x32xf32>
    %36 = vector.broadcast %35 : vector<1x32xf32> to vector<64x32xf32>
    %37 = arith.addf %34, %36 : vector<64x32xf32>
    %cst_30 = arith.constant 0.000000e+00 : f32
    %38 = vector.broadcast %cst_30 : f32 to vector<64x32xf32>
    %39 = arith.maximumf %37, %38 : vector<64x32xf32>
    %40 = arith.truncf %39 : vector<64x32xf32> to vector<64x32xbf16>
    %c0_31 = arith.constant 0 : index
    %c0_32 = arith.constant 0 : index
    %41 = vector.load %arg12[%c0_31, %c0_32] : memref<32x128xbf16, #tpu.memory_space<vmem>>, vector<32x128xbf16>
    %cst_33 = arith.constant dense<0.000000e+00> : vector<64x128xf32>
    %42 = tpu.matmul %40, %41, %cst_33 {dimension_numbers = #tpu.dot_dimension_numbers<[1], [0], [0], [1], [0, 0, 1, 1], [], []>} : vector<64x32xbf16>, vector<32x128xbf16>, vector<64x128xf32> -> vector<64x128xf32>
    %c0_34 = arith.constant 0 : index
    %c0_35 = arith.constant 0 : index
    %43 = vector.load %arg13[%c0_34, %c0_35] : memref<1x128xf32, #tpu.memory_space<vmem>>, vector<1x128xf32>
    %44 = vector.broadcast %43 : vector<1x128xf32> to vector<64x128xf32>
    %45 = arith.addf %42, %44 : vector<64x128xf32>
    %46 = arith.negf %45 : vector<64x128xf32>
    %47 = math.exp %46 : vector<64x128xf32>
    %cst_36 = arith.constant 1.000000e+00 : f32
    %48 = vector.broadcast %cst_36 : f32 to vector<64x128xf32>
    %49 = arith.addf %48, %47 : vector<64x128xf32>
    %50 = arith.divf %48, %49 : vector<64x128xf32>
    %51 = arith.truncf %50 : vector<64x128xf32> to vector<64x128xbf16>
    %c0_37 = arith.constant 0 : index
    %c0_38 = arith.constant 0 : index
    %52 = vector.load %arg15[%c0_37, %c0_38] : memref<64x128xbf16, #tpu.memory_space<vmem>>, vector<64x128xbf16>
    tpu.vector_store %arg15[%c0_37, %c0_38], %51 {strides = array<i32>} : memref<64x128xbf16, #tpu.memory_space<vmem>>, vector<64x128xbf16>,
    return
  }
  func.func @transform_0(%arg0: i32) -> (i32, i32) {
    %c0_i32 = arith.constant 0 : i32
    %c0_i32_0 = arith.constant 0 : i32
    return %arg0, %c0_i32 : i32, i32
  }
  func.func @transform_1(%arg0: i32) -> (i32, i32) {
    %c0_i32 = arith.constant 0 : i32
    %c0_i32_0 = arith.constant 0 : i32
    %c0_i32_1 = arith.constant 0 : i32
    return %c0_i32, %c0_i32_0 : i32, i32
  }
  func.func @transform_2(%arg0: i32) -> (i32, i32) {
    %c0_i32 = arith.constant 0 : i32
    %c0_i32_0 = arith.constant 0 : i32
    %c0_i32_1 = arith.constant 0 : i32
    return %c0_i32, %c0_i32_0 : i32, i32
  }
  func.func @transform_3(%arg0: i32) -> (i32, i32) {
    %c0_i32 = arith.constant 0 : i32
    %c0_i32_0 = arith.constant 0 : i32
    %c0_i32_1 = arith.constant 0 : i32
    return %c0_i32, %c0_i32_0 : i32, i32
  }
  func.func @transform_4(%arg0: i32) -> (i32, i32) {
    %c0_i32 = arith.constant 0 : i32
    %c0_i32_0 = arith.constant 0 : i32
    %c0_i32_1 = arith.constant 0 : i32
    return %c0_i32, %c0_i32_0 : i32, i32
  }
  func.func @transform_5(%arg0: i32) -> (i32, i32) {
    %c0_i32 = arith.constant 0 : i32
    %c0_i32_0 = arith.constant 0 : i32
    %c0_i32_1 = arith.constant 0 : i32
    return %c0_i32, %c0_i32_0 : i32, i32
  }
  func.func @transform_6(%arg0: i32) -> (i32, i32) {
    %c0_i32 = arith.constant 0 : i32
    %c0_i32_0 = arith.constant 0 : i32
    %c0_i32_1 = arith.constant 0 : i32
    return %c0_i32, %c0_i32_0 : i32, i32
  }
  func.func @transform_7(%arg0: i32) -> (i32, i32) {
    %c0_i32 = arith.constant 0 : i32
    %c0_i32_0 = arith.constant 0 : i32
    %c0_i32_1 = arith.constant 0 : i32
    return %c0_i32, %c0_i32_0 : i32, i32
  }
  func.func @transform_8(%arg0: i32) -> (i32, i32) {
    %c0_i32 = arith.constant 0 : i32
    %c0_i32_0 = arith.constant 0 : i32
    %c0_i32_1 = arith.constant 0 : i32
    return %c0_i32, %c0_i32_0 : i32, i32
  }
  func.func @transform_9(%arg0: i32) -> (i32, i32) {
    %c0_i32 = arith.constant 0 : i32
    %c0_i32_0 = arith.constant 0 : i32
    %c0_i32_1 = arith.constant 0 : i32
    return %c0_i32, %c0_i32_0 : i32, i32
  }
  func.func @transform_10(%arg0: i32) -> (i32, i32) {
    %c0_i32 = arith.constant 0 : i32
    %c0_i32_0 = arith.constant 0 : i32
    %c0_i32_1 = arith.constant 0 : i32
    return %c0_i32, %c0_i32_0 : i32, i32
  }
  func.func @transform_11(%arg0: i32) -> (i32, i32) {
    %c0_i32 = arith.constant 0 : i32
    %c0_i32_0 = arith.constant 0 : i32
    %c0_i32_1 = arith.constant 0 : i32
    return %c0_i32, %c0_i32_0 : i32, i32
  }
  func.func @transform_12(%arg0: i32) -> (i32, i32) {
    %c0_i32 = arith.constant 0 : i32
    %c0_i32_0 = arith.constant 0 : i32
    %c0_i32_1 = arith.constant 0 : i32
    return %c0_i32, %c0_i32_0 : i32, i32
  }
  func.func @transform_13(%arg0: i32) -> (i32, i32) {
    %c0_i32 = arith.constant 0 : i32
    %c0_i32_0 = arith.constant 0 : i32
    return %arg0, %c0_i32 : i32, i32
  }
  func.func @transform_14(%arg0: i32) -> (i32, i32) {
    %c0_i32 = arith.constant 0 : i32
    %c0_i32_0 = arith.constant 0 : i32
    return %arg0, %c0_i32 : i32, i32
  }
}

</mosaic_0001>

<bundles_post_ra>
// kernel: tpu_custom_call.1
= control target key start
LH: loop header
LB: loop body
LE: loop exit
PB: predicated region body
PF: predicated region fallthrough
CT: control target
= control target key end

     0   :  { %s2142_s0 = inlined_call_operand.vmem [shape: f32[128,32], index: 0, kind: input, shape index: {}]   ;;  %s2143_s1 = inlined_call_operand.vmem [shape: bf16[32,32], index: 1, kind: input, shape index: {}]   ;;  %s2144_s2 = inlined_call_operand.vmem [shape: f32[1,32], index: 2, kind: input, shape index: {}]   ;;  %s2145_s3 = inlined_call_operand.vmem [shape: bf16[32,32], index: 3, kind: input, shape index: {}]   ;;  %s2146_s4 = inlined_call_operand.vmem [shape: f32[1,32], index: 4, kind: input, shape index: {}]   ;;  %s2147_s5 = inlined_call_operand.vmem [shape: bf16[32,128], index: 5, kind: input, shape index: {}]   ;;  %s2148_s6 = inlined_call_operand.vmem [shape: f32[1,128], index: 6, kind: input, shape index: {}]   ;;  %s2149_s7 = inlined_call_operand.vmem [shape: bf16[32,32], index: 7, kind: input, shape index: {}]   ;;  %s2150_s8 = inlined_call_operand.vmem [shape: f32[1,32], index: 8, kind: input, shape index: {}]   ;;  %s2151_s9 = inlined_call_operand.vmem [shape: bf16[32,32], index: 9, kind: input, shape index: {}]   ;;  %s2152_s10 = inlined_call_operand.vmem [shape: f32[1,32], index: 10, kind: input, shape index: {}]   ;;  %s2153_s11 = inlined_call_operand.vmem [shape: bf16[32,128], index: 11, kind: input, shape index: {}]   ;;  %s2154_s12 = inlined_call_operand.vmem [shape: f32[1,128], index: 12, kind: input, shape index: {}]   ;;  %s2155_s13 = inlined_call_operand.hbm [shape: bf16[128,128], index: 13, kind: output, shape index: {0}]   ;;  %s2156_s14 = inlined_call_operand.hbm [shape: bf16[128,128], index: 14, kind: output, shape index: {1}]  }
   0x1   :  { %2162 = sst [smem:[#allocation10_spill]] %s2142_s0 }
   0x2   :  { %2163 = sst [smem:[#allocation11_spill]] %s2143_s1 }
   0x3   :  { %2164 = sst [smem:[#allocation12_spill]] %s2144_s2 }
   0x4   :  { %20 = vsyncpa [#allocation3], 0 }
   0x5   :  { %22 = vsyncpa [#allocation3 + $0x1], 0 }
   0x6   :  { %23 = vsyncpa [#allocation5], 0 }
   0x7   :  { %25 = vsyncpa [#allocation5 + $0x1], 0  ;;  %s1907_s29 = smov 0   ;;  %s1909_s30 = smov 0  }
   0x8   :  { %s1911_s15 = smov 0   ;;  %s1913_s16 = smov 0  }
   0x9 LB: > { %2165 = sst [smem:[#allocation8_spill]] %s1822_s15  ;;  %s1928_s17 = sadd.s32 4294967295, %s1826_s16   ;;  %s1826_s16 = sphi %s1913_s16, %s2181_s16   ;;  %s1822_s15 = sphi %s1911_s15, %s2178_s15   ;;  %s1818_s30 = sphi %s1909_s30, %s2180_s30   ;;  %s1814_s29 = sphi %s1907_s29, %s2179_s29  }
   0xa   : > { %s1388_s18 = sadd.s32 4294967294, %s1826_s16   ;;  %s1932_s19 = sadd.s32 1, %s1826_s16  }
   0xb   : > { %s316_s20 = sadd.s32 1, %s1822_s15  ;;  %s313_s21 = ssub.s32 %s1826_s16, %s1932_s19 }
   0xc   : > { %p326_p0 = scmp.ne.s32.totalorder %s1822_s15, %s1818_s30  ;;  %p314_p1 = scmp.eq.s32.totalorder %s313_s21, 0 }
   0xd   : > { %p327_p2 = scmp.eq.s32.totalorder %s1928_s17, 1  ;;  %p332_p3 = scmp.ne.s32.totalorder %s1818_s30, %s1814_s29 }
   0xe   : > { %p333_p4 = scmp.eq.s32.totalorder %s1388_s18, 1  ;;  %p1391_p7 = scmp.ge.s32.totalorder %s1826_s16, 1 }
   0xf   : > { %s1943_s22 = scalar_select %p314_p1, %s1822_s15, %s316_s20  }
  0x10   : > { %p1945_p5 = por %p327_p2, %p326_p0  ;;  %p1949_p6 = por %p333_p4, %p332_p3 }
  0x11   : > { %2166 = sst [smem:[#allocation9_spill]] %s1943_s22  ;;  %p422_p8 = scmp.lt.s32.totalorder %s1826_s16, 3 }
  0x13   : > { %p423_p9 = pnand %p1391_p7, %p422_p8 }
  0x14   : > { %s2169_s1 = sld [smem:[#allocation11_spill]] (!%p423_p9)  ;;  %s1394_s27 = sshll.u32 (!%p423_p9), %s1928_s17, 3  ;;  %vm517_vm0 = vcmask (!%p423_p9), 261120   ;;  %v1690_v14 = vld [vmem:[%s2145_s3] sm:$0xff] (!%p423_p9)   ;;  %v1691_v15 = vld [vmem:[%s2145_s3 + $0x8] sm:$0xff] (!%p423_p9)  }
  0x15   : > { %426 = sbr.rel (%p423_p9) target bundleno = 985 (0x3d9), region = 72  ;;  %p474_p10 = scmp.lt.s32.totalorder (!%p423_p9), %s1394_s27, 15  ;;  %1582 = vmatprep.subr.bf16.mxu1 (!%p423_p9), %v1690_v14  ;;  %v1692_v16 = vld [vmem:[%s2149_s7] sm:$0xff] (!%p423_p9)   ;;  %v1693_v36 = vld [vmem:[%s2149_s7 + $0x8] sm:$0xff] (!%p423_p9)  }
  0x16   : > { %s2170_s0 = sld [smem:[#allocation10_spill]] (!%p423_p9)  ;;  %1583 = vmatpush3.bf16.msra.mxu1 (!%p423_p9), %v1690_v14  ;;  %v1694_v17 = vld [vmem:[%s2147_s5] sm:$0xff] (!%p423_p9)   ;;  %s2171_s2 = sld [smem:[#allocation12_spill]] (!%p423_p9)  ;;  %v1695_v48 = vld [vmem:[%s2147_s5 + $0x8] sm:$0xff] (!%p423_p9)  }
  0x17   : > { %1584 = vmatprep.subr.bf16.mxu1 (!%p423_p9), %v1691_v15  ;;  %v1696_v49 = vld [vmem:[%s2151_s9] sm:$0xff] (!%p423_p9)   ;;  %s2025_s21 = sand.u32 (!%p423_p9), 1, %s1818_s30  }
  0x18   : > { %v1403_v50 = vld [vmem:[%s2146_s4] ss:$0 sm:$0xff] (!%p423_p9)  ;;  %s2158_s26 = sshll.u32 (!%p423_p9), %s2025_s21, 5 }
  0x19   : > { %v1425_v14 = vld [vmem:[%s2150_s8] ss:$0 sm:$0xff] (!%p423_p9) }
  0x1a   : > { %v1688_v0 = vld [vmem:[%s2169_s1] sm:$0xff] (!%p423_p9)   ;;  %v1689_v1 = vld [vmem:[%s2169_s1 + $0x8] sm:$0xff] (!%p423_p9)   ;;  %1585 = vmatpush3.bf16.msra.mxu1 (!%p423_p9), %v1691_v15 }
  0x1b   : > { %1570 = vmatprep.subr.bf16.mxu0 (!%p423_p9), %v1688_v0  ;;  %1606 = vmatprep.subr.bf16.mxu1 (!%p423_p9), %v1692_v16 }
  0x1c   : > { %1571 = vmatpush3.bf16.msra.mxu0 %v1688_v0  ;;  %s2183_s27 = smov (!%p474_p10, %s1394_s27), 15  ;;  %v1396_v18 = vld [vmem:[%s2171_s2] ss:$0 sm:$0xff] }
  0x1d   : > { %1572 = vmatprep.subr.bf16.mxu0 %v1689_v1  ;;  %s1395_s20 = sshll.u32 %s2183_s27, 3  ;;  %s2033_s27 = scalar_lea.vmem [#allocation2], %s2158_s26 }
  0x1e   : > { %s477_s15 = scalar_lea.vmem %s2170_s0, %s1395_s20  ;;  %s2159_s20 = sshll.u32 %s1928_s17, 9 }
  0x1f   : > { %v482_v2 = vld [vmem:[%s477_s15] sm:$0xff]  ;;  %v483_v3 = vld [vmem:[%s477_s15 + $0x8] sm:$0xff]  ;;  %v484_v4 = vld [vmem:[%s477_s15 + $0x10] sm:$0xff]  ;;  %s2055_s28 = scalar_lea.hbm %s2155_s13, %s2159_s20  ;;  %s1828_s0 = smov [#allocation2]  }
  0x20   : > { %1573 = vmatpush3.bf16.msra.mxu0 %v1689_v1  ;;  %v490_v5 = vpack.c.bf16 %v483_v3, %v482_v2  ;;  %v485_v6 = vld [vmem:[%s477_s15 + $0x18] sm:$0xff]  ;;  %v486_v7 = vld [vmem:[%s477_s15 + $0x20] sm:$0xff]  ;;  %v487_v8 = vld [vmem:[%s477_s15 + $0x28] sm:$0xff] }
  0x21   : > { %v491_v9 = vpack.c.bf16 %v485_v6, %v484_v4  ;;  %v492_v10 = vpack.c.bf16 %v487_v8, %v486_v7  ;;  %v488_v11 = vld [vmem:[%s477_s15 + $0x30] sm:$0xff]  ;;  %v489_v12 = vld [vmem:[%s477_s15 + $0x38] sm:$0xff]  ;;  %1594 = vmatprep.subr.bf16.mxu0 %v1694_v17  ;;  %v1697_v4 = vld [vmem:[%s2151_s9 + $0x8] sm:$0xff]   ;;  %s1278_s15 = sshll.u32 %s2033_s27, 4  ;;  %s2047_s15 = int_to_ptr.vmem [resolvable:$true] %s1278_s15 }
  0x22   : > { %1574 = vmatprep.mubr.msk.bf16.mxu0 %vm517_vm0, %v490_v5  ;;  %v493_v13 = vpack.c.bf16 %v489_v12, %v488_v11  ;;  %s1732_s26 = scalar_lea.vmem %s2047_s15, 512 }
  0x23   : > { %1575 = vmatmul.mubr.msk.bf16.vlgmr.msra.gmra.mrb[0].mxu0 %vm517_vm0, %v491_v9  ;;  %p1733_p11 = scmp.ne.s32.totalorder %s2047_s15, %s1732_s26 }
  0x24   : > { %1578 = vmatprep.mubr.msk.bf16.mxu0 %vm517_vm0, %v492_v10  ;;  %1595 = vmatpush3.bf16.msra.mxu0 %v1694_v17 }
  0x25   : > { %1596 = vmatprep.subr.bf16.mxu0 %v1695_v48  ;;  %p1734_p12 = pnand %p1733_p11, %p1945_p5 }
  0x27   : > { %p1735_p13 = pneg %p1734_p12 }
  0x28   : > { %1597 = vmatpush3.bf16.msra.mxu0 %v1695_v48  ;;  %v1410_v48 = vld [vmem:[%s2148_s6] ss:$0 sm:$0xff] }
  0x29   : > { %1618 = vmatprep.subr.bf16.mxu0 %v1696_v49 }
  0x2b   : > { %1579 = vmatmul.mubr.msk.bf16.gmra.mrb[4].mxu0 %vm517_vm0, %v493_v13 }
  0xf6   : > { %v1576_v19 = vpop.f32.mrb[0].mxu0 }
  0xf7   : > { %v573_v20 = vadd.f32 %v1576_v19, %v1396_v18  ;;  %v564_v21 = vpop.f32.mrb[1].mxu0 }
  0xf8   : > { %v565_v22 = vadd.f32 %v1396_v18, %v564_v21  ;;  %v1577_v23 = vpop.f32.mrb[2].mxu0 }
  0xf9   : > { %v576_v24 = vadd.f32 %v1577_v23, %v1396_v18  ;;  %v567_v25 = vpop.f32.mrb[3].mxu0  ;;  %v597_v27 = vmax.f32 %v573_v20, 0.0 }
  0xfa   : > { %v568_v26 = vadd.f32 %v1396_v18, %v567_v25  ;;  %v595_v29 = vmax.f32 %v565_v22, 0.0 }
  0xfb   : > { %v598_v28 = vmax.f32 %v576_v24, 0.0 }
  0xfc   : > { %v596_v30 = vmax.f32 %v568_v26, 0.0 }
  0xfd   : > { %v604_v31 = vpack.c.bf16 %v598_v28, %v597_v27 }
  0xfe   : > { %v1580_v32 = vpop.f32.mrb[4].mxu0  ;;  %v603_v33 = vpack.c.bf16 %v596_v30, %v595_v29 }
  0xff   : > { %v589_v34 = vadd.f32 %v1580_v32, %v1396_v18  ;;  %v580_v35 = vpop.f32.mrb[5].mxu0 }
 0x100   : > { %v581_v37 = vadd.f32 %v1396_v18, %v580_v35  ;;  %v1581_v38 = vpop.f32.mrb[6].mxu0  ;;  %1586 = vmatprep.mubr.msk.bf16.mxu1 %vm517_vm0, %v603_v33 }
 0x101   : > { %v592_v39 = vadd.f32 %v1581_v38, %v1396_v18  ;;  %v583_v40 = vpop.f32.mrb[7].mxu0  ;;  %1587 = vmatmul.mubr.msk.bf16.vlgmr.msra.gmra.mrb[0].mxu1 %vm517_vm0, %v604_v31  ;;  %v601_v42 = vmax.f32 %v589_v34, 0.0 }
 0x102   : > { %v584_v41 = vadd.f32 %v1396_v18, %v583_v40  ;;  %1607 = vmatpush3.bf16.msra.mxu1 %v1692_v16  ;;  %v599_v44 = vmax.f32 %v581_v37, 0.0 }
 0x103   : > { %v602_v43 = vmax.f32 %v592_v39, 0.0  ;;  %1608 = vmatprep.subr.bf16.mxu1 %v1693_v36 }
 0x104   : > { %v600_v45 = vmax.f32 %v584_v41, 0.0 }
 0x105   : > { %v606_v46 = vpack.c.bf16 %v602_v43, %v601_v42 }
 0x106   : > { %v605_v47 = vpack.c.bf16 %v600_v45, %v599_v44  ;;  %1609 = vmatpush3.bf16.msra.mxu1 %v1693_v36  ;;  %v1698_v45 = vld [vmem:[%s2153_s11] sm:$0xff]  }
 0x107   : > { %1630 = vmatprep.subr.bf16.mxu1 %v1698_v45 }
 0x108   : > { %1590 = vmatprep.mubr.msk.bf16.mxu1 %vm517_vm0, %v605_v47 }
 0x109   : > { %1591 = vmatmul.mubr.msk.bf16.gmra.mrb[4].mxu1 %vm517_vm0, %v606_v46  ;;  %v1699_v46 = vld [vmem:[%s2153_s11 + $0x8] sm:$0xff]  }
 0x10a   : > { %1610 = vmatprep.mubr.msk.bf16.mxu1 %vm517_vm0, %v490_v5 }
 0x111   : > { %1611 = vmatmul.mubr.msk.bf16.vlgmr.msra.gmra.mrb[8].mxu1 %vm517_vm0, %v491_v9 }
 0x112   : > { %1614 = vmatprep.mubr.msk.bf16.mxu1 %vm517_vm0, %v492_v10  ;;  %1631 = vmatpush3.bf16.msra.mxu1 %v1698_v45 }
 0x113   : > { %1632 = vmatprep.subr.bf16.mxu1 %v1699_v46 }
 0x116   : > { %1633 = vmatpush3.bf16.msra.mxu1 %v1699_v46 }
 0x119   : > { %1615 = vmatmul.mubr.msk.bf16.gmra.mrb[12].mxu1 %vm517_vm0, %v493_v13 }
 0x1d4   : > { %v1588_v51 = vpop.f32.mrb[0].mxu1 }
 0x1d5   : > { %v685_v52 = vadd.f32 %v1588_v51, %v1403_v50  ;;  %v676_v53 = vpop.f32.mrb[1].mxu1 }
 0x1d6   : > { %v677_v54 = vadd.f32 %v1403_v50, %v676_v53  ;;  %v1589_v55 = vpop.f32.mrb[2].mxu1 }
 0x1d7   : > { %v688_v56 = vadd.f32 %v1589_v55, %v1403_v50  ;;  %v679_v57 = vpop.f32.mrb[3].mxu1  ;;  %v709_v59 = vmax.f32 %v685_v52, 0.0 }
 0x1d8   : > { %v680_v58 = vadd.f32 %v1403_v50, %v679_v57  ;;  %v707_v61 = vmax.f32 %v677_v54, 0.0 }
 0x1d9   : > { %v710_v60 = vmax.f32 %v688_v56, 0.0 }
 0x1da   : > { %v708_v62 = vmax.f32 %v680_v58, 0.0 }
 0x1db   : > { %v716_v63 = vpack.c.bf16 %v710_v60, %v709_v59 }
 0x1dc   : > { %v715_v0 = vpack.c.bf16 %v708_v62, %v707_v61  ;;  %v1592_v1 = vpop.f32.mrb[4].mxu1 }
 0x1dd   : > { %v701_v2 = vadd.f32 %v1592_v1, %v1403_v50  ;;  %v692_v3 = vpop.f32.mrb[5].mxu1 }
 0x1de   : > { %v693_v5 = vadd.f32 %v1403_v50, %v692_v3  ;;  %v1593_v6 = vpop.f32.mrb[6].mxu1  ;;  %1598 = vmatprep.mubr.msk.bf16.mxu0 %vm517_vm0, %v715_v0 }
 0x1df   : > { %v704_v7 = vadd.f32 %v1593_v6, %v1403_v50  ;;  %v695_v8 = vpop.f32.mrb[7].mxu1  ;;  %1599 = vmatmul.mubr.msk.bf16.vlgmr.msra.gmra.mrb[8].mxu0 %vm517_vm0, %v716_v63  ;;  %v713_v10 = vmax.f32 %v701_v2, 0.0 }
 0x1e0   : > { %v696_v9 = vadd.f32 %v1403_v50, %v695_v8  ;;  %1619 = vmatpush3.bf16.msra.mxu0 %v1696_v49  ;;  %v711_v12 = vmax.f32 %v693_v5, 0.0 }
 0x1e1   : > { %v714_v11 = vmax.f32 %v704_v7, 0.0  ;;  %1620 = vmatprep.subr.bf16.mxu0 %v1697_v4 }
 0x1e2   : > { %v712_v13 = vmax.f32 %v696_v9, 0.0 }
 0x1e3   : > { %v718_v15 = vpack.c.bf16 %v714_v11, %v713_v10 }
 0x1e4   : > { %v717_v16 = vpack.c.bf16 %v712_v13, %v711_v12  ;;  %v1612_v17 = vpop.f32.mrb[8].mxu1  ;;  %1621 = vmatpush3.bf16.msra.mxu0 %v1697_v4  ;;  %v1432_v4 = vld [vmem:[%s2152_s10] ss:$0 sm:$0xff] }
 0x1e5   : > { %v925_v18 = vadd.f32 %v1612_v17, %v1425_v14  ;;  %v916_v19 = vpop.f32.mrb[9].mxu1 }
 0x1e6   : > { %v917_v20 = vadd.f32 %v1425_v14, %v916_v19  ;;  %1602 = vmatprep.mubr.msk.bf16.mxu0 %vm517_vm0, %v717_v16  ;;  %v1613_v21 = vpop.f32.mrb[10].mxu1 }
 0x1e7   : > { %v928_v22 = vadd.f32 %v1613_v21, %v1425_v14  ;;  %1603 = vmatmul.mubr.msk.bf16.gmra.mrb[12].mxu0 %vm517_vm0, %v718_v15  ;;  %v919_v23 = vpop.f32.mrb[11].mxu1  ;;  %v949_v25 = vmax.f32 %v925_v18, 0.0 }
 0x1e8   : > { %v920_v24 = vadd.f32 %v1425_v14, %v919_v23  ;;  %v947_v27 = vmax.f32 %v917_v20, 0.0 }
 0x1e9   : > { %v950_v26 = vmax.f32 %v928_v22, 0.0 }
 0x1ea   : > { %v948_v28 = vmax.f32 %v920_v24, 0.0 }
 0x1eb   : > { %v956_v29 = vpack.c.bf16 %v950_v26, %v949_v25 }
 0x1ec   : > { %v955_v30 = vpack.c.bf16 %v948_v28, %v947_v27  ;;  %v1616_v31 = vpop.f32.mrb[12].mxu1 }
 0x1ed   : > { %v941_v32 = vadd.f32 %v1616_v31, %v1425_v14  ;;  %v932_v33 = vpop.f32.mrb[13].mxu1 }
 0x1ee   : > { %v933_v34 = vadd.f32 %v1425_v14, %v932_v33  ;;  %v1617_v35 = vpop.f32.mrb[14].mxu1  ;;  %1622 = vmatprep.mubr.msk.bf16.mxu0 %vm517_vm0, %v955_v30 }
 0x1ef   : > { %v944_v36 = vadd.f32 %v1617_v35, %v1425_v14  ;;  %v935_v37 = vpop.f32.mrb[15].mxu1  ;;  %1623 = vmatmul.mubr.msk.bf16.vlgmr.msra.gmra.mrb[16].mxu0 %vm517_vm0, %v956_v29  ;;  %v953_v39 = vmax.f32 %v941_v32, 0.0 }
 0x1f0   : > { %v936_v38 = vadd.f32 %v1425_v14, %v935_v37  ;;  %v951_v41 = vmax.f32 %v933_v34, 0.0 }
 0x1f1   : > { %v954_v40 = vmax.f32 %v944_v36, 0.0 }
 0x1f2   : > { %v952_v42 = vmax.f32 %v936_v38, 0.0 }
 0x1f3   : > { %v958_v43 = vpack.c.bf16 %v954_v40, %v953_v39 }
 0x1f4   : > { %v957_v44 = vpack.c.bf16 %v952_v42, %v951_v41 }
 0x1f6   : > { %1626 = vmatprep.mubr.msk.bf16.mxu0 %vm517_vm0, %v957_v44 }
 0x1f7   : > { %1627 = vmatmul.mubr.msk.bf16.gmra.mrb[20].mxu0 %vm517_vm0, %v958_v43 }
 0x2b2   : > { %v1600_v47 = vpop.f32.mrb[8].mxu0 }
 0x2b3   : > { %v788_v49 = vpop.f32.mrb[9].mxu0  ;;  %v797_v51 = vadd.f32 %v1600_v47, %v1410_v48 }
 0x2b4   : > { %v1601_v50 = vpop.f32.mrb[10].mxu0  ;;  %v789_v54 = vadd.f32 %v1410_v48, %v788_v49 }
 0x2b5   : > { %v800_v52 = vadd.f32 %v1601_v50, %v1410_v48  ;;  %v791_v53 = vpop.f32.mrb[11].mxu0 }
 0x2b6   : > { %v792_v55 = vadd.f32 %v1410_v48, %v791_v53 }
 0x2b7   : > { %v1496_v56 = vpack.c.bf16 %v800_v52, %v797_v51 }
 0x2b8   : > { %v1491_v57 = vpack.c.bf16 %v792_v55, %v789_v54 }
 0x2b9   : > { %1528 = vst [vmem:[%s2033_s27 + $0x8] sm:$0xff] %v1496_v56  }
 0x2ba   : > { %1492 = vst [vmem:[%s2033_s27] sm:$0xff] %v1491_v57   ;;  %v1604_v58 = vpop.f32.mrb[12].mxu0 }
 0x2bb   : > { %v804_v59 = vpop.f32.mrb[13].mxu0  ;;  %v813_v61 = vadd.f32 %v1604_v58, %v1410_v48 }
 0x2bc   : > { %v1605_v60 = vpop.f32.mrb[14].mxu0  ;;  %v805_v0 = vadd.f32 %v1410_v48, %v804_v59 }
 0x2bd   : > { %v816_v62 = vadd.f32 %v1605_v60, %v1410_v48  ;;  %v807_v63 = vpop.f32.mrb[15].mxu0 }
 0x2be   : > { %v808_v1 = vadd.f32 %v1410_v48, %v807_v63 }
 0x2bf   : > { %v1506_v2 = vpack.c.bf16 %v816_v62, %v813_v61 }
 0x2c0   : > { %v1501_v3 = vpack.c.bf16 %v808_v1, %v805_v0 }
 0x2c1   : > { %1530 = vst [vmem:[%s2033_s27 + $0x18] sm:$0xff] %v1506_v2  }
 0x2c2   : > { %1529 = vst [vmem:[%s2033_s27 + $0x10] sm:$0xff] %v1501_v3   ;;  %v1624_v5 = vpop.f32.mrb[16].mxu0  ;;  %s1736_s27 = sshll.u32 %s1828_s0, 4  ;;  %s1737_s27 = int_to_ptr.vmem [resolvable:$false] %s1736_s27 }
 0x2c3   : > { %v1037_v6 = vadd.f32 %v1624_v5, %v1432_v4  ;;  %v1028_v7 = vpop.f32.mrb[17].mxu0  ;;  %s1738_s1 = scalar_lea.vmem %s1737_s27, 1024  ;;  %p1739_p0 = scmp.lt.s32.totalorder %s2047_s15, %s1737_s27 }
 0x2c4   : > { %v1029_v8 = vadd.f32 %v1432_v4, %v1028_v7  ;;  %v1625_v9 = vpop.f32.mrb[18].mxu0  ;;  %p1740_p1 = scmp.lt.s32.totalorder %s1738_s1, %s1732_s26 }
 0x2c5   : > { %v1040_v10 = vadd.f32 %v1625_v9, %v1432_v4  ;;  %v1031_v11 = vpop.f32.mrb[19].mxu0  ;;  %v1061_v13 = vmax.f32 %v1037_v6, 0.0 }
 0x2c6   : > { %v1032_v12 = vadd.f32 %v1432_v4, %v1031_v11  ;;  %v1059_v15 = vmax.f32 %v1029_v8, 0.0  ;;  %p1741_p2 = por %p1740_p1, %p1739_p0 }
 0x2c7   : > { %v1062_v14 = vmax.f32 %v1040_v10, 0.0 }
 0x2c8   : > { %v1060_v16 = vmax.f32 %v1032_v12, 0.0  ;;  %p1742_p3 = pnand %p1741_p2, %p1735_p13 }
 0x2c9   : > { %v1068_v17 = vpack.c.bf16 %v1062_v14, %v1061_v13 }
 0x2ca   : > { %v1067_v18 = vpack.c.bf16 %v1060_v16, %v1059_v15  ;;  %v1628_v19 = vpop.f32.mrb[20].mxu0 }
 0x2cb   : > { %v1053_v20 = vadd.f32 %v1628_v19, %v1432_v4  ;;  %v1044_v21 = vpop.f32.mrb[21].mxu0 }
 0x2cc   : > { %v1045_v22 = vadd.f32 %v1432_v4, %v1044_v21  ;;  %v1629_v23 = vpop.f32.mrb[22].mxu0  ;;  %1634 = vmatprep.mubr.msk.bf16.mxu1 %vm517_vm0, %v1067_v18 }
 0x2cd   : > { %v1056_v24 = vadd.f32 %v1629_v23, %v1432_v4  ;;  %v1047_v25 = vpop.f32.mrb[23].mxu0  ;;  %1635 = vmatmul.mubr.msk.bf16.vlgmr.msra.gmra.mrb[16].mxu1 %vm517_vm0, %v1068_v17  ;;  %v1065_v27 = vmax.f32 %v1053_v20, 0.0 }
 0x2ce   : > { %v1048_v26 = vadd.f32 %v1432_v4, %v1047_v25  ;;  %v1063_v29 = vmax.f32 %v1045_v22, 0.0 }
 0x2cf   : > { %v1066_v28 = vmax.f32 %v1056_v24, 0.0 }
 0x2d0   : > { %v1064_v30 = vmax.f32 %v1048_v26, 0.0 }
 0x2d1   : > { %v1070_v31 = vpack.c.bf16 %v1066_v28, %v1065_v27 }
 0x2d2   : > { %v1069_v32 = vpack.c.bf16 %v1064_v30, %v1063_v29 }
 0x2d4   : > { %1638 = vmatprep.mubr.msk.bf16.mxu1 %vm517_vm0, %v1069_v32 }
 0x2d5   : > { %1639 = vmatmul.mubr.msk.bf16.gmra.mrb[20].mxu1 %vm517_vm0, %v1070_v31 }
 0x2d6   : > { %1745 = shalt.err (!%p1742_p3)
}
 0x2d7   : > { %s1746_s22 = scalar_lea.hbm %s2055_s28, 512  ;;  %s1750_s0 = scalar_lea.hbm %s2155_s13, 1024 }
 0x2d8   : > { %p1747_p4 = scmp.ne.s32.totalorder %s2055_s28, %s1746_s22  ;;  %p1751_p9 = scmp.lt.u32.totalorder %s2055_s28, %s2155_s13 }
 0x2d9   : > { %p1752_p10 = scmp.lt.u32.totalorder %s1750_s0, %s1746_s22  ;;  %p1754_p12 = scmp.lt.u32.totalorder %s1746_s22, %s2055_s28 }
 0x2da   : > { %p1748_p7 = pnand %p1747_p4, %p1945_p5 }
 0x2db   : > { %p1753_p11 = por %p1752_p10, %p1751_p9 }
 0x2dc   : > { %p1749_p8 = pneg %p1748_p7 }
 0x2dd   : > { %p1755_p13 = por %p1754_p12, %p1753_p11 }
 0x2df   : > { %p1756_p0 = pnand %p1755_p13, %p1749_p8 }
 0x2e1   : > { %1759 = shalt.err (!%p1756_p0)
}
 0x2e2   : > { %s2160_s1 = smov 64   ;;  %s2161_s26 = smov 4   ;;  %v1439_v33 = vld [vmem:[%s2154_s12] ss:$0 sm:$0xff] }
 0x2e3   : > { %s2172_s20 = scalar_lea.sflag [#allocation3], %s2025_s21  ;;  %s2174_s0 = sshll.u32 %s1928_s17, 9 }
 0x2e4   : > { %1642 = dma.vmem_to_hbm [thread:$0]  (%p1945_p5), %s2047_s15, 512, %s2055_s28, %s2172_s20, %s2160_s1, %s2160_s1, %s2161_s26  }
 0x2e5   : > { %s2173_s15 = sshll.u32 %s2025_s21, 5  ;;  %s2096_s18 = scalar_lea.hbm %s2156_s14, %s2174_s0 }
 0x2e6   : > { %s472_s28 = scalar_lea.vmem [#allocation4], %s2173_s15  ;;  %s1265_s25 = scalar_lea.sflag [#allocation5], %s2025_s21 }
 0x2e7   : > { %s1294_s22 = sshll.u32 %s472_s28, 4  ;;  %s1831_s1 = smov [#allocation4]   ;;  %s2089_s22 = int_to_ptr.vmem [resolvable:$true] %s1294_s22 }
 0x2e8   : > { %s1760_s15 = scalar_lea.vmem %s2089_s22, 512  ;;  %s1764_s26 = sshll.u32 %s1831_s1, 4  ;;  %s1765_s26 = int_to_ptr.vmem [resolvable:$false] %s1764_s26 }
 0x2e9   : > { %p1761_p1 = scmp.ne.s32.totalorder %s2089_s22, %s1760_s15  ;;  %s1766_s2 = scalar_lea.vmem %s1765_s26, 1024 }
 0x2ea   : > { %p1767_p4 = scmp.lt.s32.totalorder %s2089_s22, %s1765_s26  ;;  %p1768_p7 = scmp.lt.s32.totalorder %s1766_s2, %s1760_s15 }
 0x2eb   : > { %p1762_p2 = pnand %p1761_p1, %p1945_p5 }
 0x2ec   : > { %p1769_p8 = por %p1768_p7, %p1767_p4 }
 0x2ed   : > { %p1763_p3 = pneg %p1762_p2 }
 0x2ef   : > { %p1770_p9 = pnand %p1769_p8, %p1763_p3 }
 0x3a0   : > { %v1636_v34 = vpop.f32.mrb[16].mxu1 }
 0x3a1   : > { %v1149_v35 = vadd.f32 %v1636_v34, %v1439_v33  ;;  %v1140_v36 = vpop.f32.mrb[17].mxu1 }
 0x3a2   : > { %v1141_v37 = vadd.f32 %v1439_v33, %v1140_v36  ;;  %v1637_v38 = vpop.f32.mrb[18].mxu1 }
 0x3a3   : > { %v1448_v39 = vmul.f32 -1.442695, %v1149_v35  ;;  %v1152_v40 = vadd.f32 %v1637_v38, %v1439_v33  ;;  %v1143_v41 = vpop.f32.mrb[19].mxu1 }
 0x3a4   : > { %v1446_v42 = vmul.f32 -1.442695, %v1141_v37  ;;  %v1144_v43 = vadd.f32 %v1439_v33, %v1143_v41 }
 0x3a5   : > { %1700 = vpow2.f32 %v1448_v39  ;;  %v1449_v44 = vmul.f32 -1.442695, %v1152_v40 }
 0x3a6   : > { %1702 = vpow2.f32 %v1446_v42  ;;  %v1447_v45 = vmul.f32 -1.442695, %v1144_v43 }
 0x3a7   : > { %1704 = vpow2.f32 %v1449_v44 }
 0x3a8   : > { %1706 = vpow2.f32 %v1447_v45  ;;  %v1640_v46 = vpop.f32.mrb[20].mxu1 }
 0x3a9   : > { %v1165_v47 = vadd.f32 %v1640_v46, %v1439_v33  ;;  %v1156_v48 = vpop.f32.mrb[21].mxu1 }
 0x3aa   : > { %v1157_v49 = vadd.f32 %v1439_v33, %v1156_v48  ;;  %v1641_v50 = vpop.f32.mrb[22].mxu1 }
 0x3ab   : > { %v1452_v51 = vmul.f32 -1.442695, %v1165_v47  ;;  %v1168_v52 = vadd.f32 %v1641_v50, %v1439_v33  ;;  %v1159_v53 = vpop.f32.mrb[23].mxu1 }
 0x3ac   : > { %v1450_v54 = vmul.f32 -1.442695, %v1157_v49  ;;  %v1160_v55 = vadd.f32 %v1439_v33, %v1159_v53 }
 0x3ad   : > { %1708 = vpow2.f32 %v1452_v51  ;;  %v1453_v56 = vmul.f32 -1.442695, %v1168_v52 }
 0x3ae   : > { %1710 = vpow2.f32 %v1450_v54  ;;  %v1451_v57 = vmul.f32 -1.442695, %v1160_v55 }
 0x3af   : > { %v1701_v58 = vpop.eup %1700  ;;  %1712 = vpow2.f32 %v1453_v56 }
 0x3b0   : > { %v1703_v59 = vpop.eup %1702  ;;  %v1197_v60 = vadd.f32 1.0, %v1701_v58  ;;  %1714 = vpow2.f32 %v1451_v57 }
 0x3b1   : > { %v1705_v61 = vpop.eup %1704  ;;  %v1195_v62 = vadd.f32 1.0, %v1703_v59 }
 0x3b2   : > { %v1707_v63 = vpop.eup %1706  ;;  %1716 = vrcp.f32 %v1197_v60  ;;  %v1198_v0 = vadd.f32 1.0, %v1705_v61 }
 0x3b3   : > { %1718 = vrcp.f32 %v1195_v62  ;;  %v1196_v1 = vadd.f32 1.0, %v1707_v63 }
 0x3b4   : > { %1720 = vrcp.f32 %v1198_v0 }
 0x3b5   : > { %1722 = vrcp.f32 %v1196_v1 }
 0x3b7   : > { %v1709_v2 = vpop.eup %1708 }
 0x3b8   : > { %v1711_v3 = vpop.eup %1710  ;;  %v1201_v4 = vadd.f32 1.0, %v1709_v2 }
 0x3b9   : > { %v1713_v5 = vpop.eup %1712  ;;  %v1199_v6 = vadd.f32 1.0, %v1711_v3 }
 0x3ba   : > { %v1715_v7 = vpop.eup %1714  ;;  %1724 = vrcp.f32 %v1201_v4  ;;  %v1202_v8 = vadd.f32 1.0, %v1713_v5 }
 0x3bb   : > { %1726 = vrcp.f32 %v1199_v6  ;;  %v1200_v9 = vadd.f32 1.0, %v1715_v7 }
 0x3bc   : > { %v1717_v10 = vpop.eup %1716  ;;  %1728 = vrcp.f32 %v1202_v8 }
 0x3bd   : > { %v1719_v11 = vpop.eup %1718  ;;  %1730 = vrcp.f32 %v1200_v9 }
 0x3be   : > { %v1721_v12 = vpop.eup %1720 }
 0x3bf   : > { %v1723_v13 = vpop.eup %1722  ;;  %v1516_v14 = vpack.c.bf16 %v1721_v12, %v1717_v10 }
 0x3c0   : > { %v1511_v15 = vpack.c.bf16 %v1723_v13, %v1719_v11 }
 0x3c1   : > { %1531 = vst [vmem:[%s472_s28 + $0x8] sm:$0xff] %v1516_v14  }
 0x3c2   : > { %1512 = vst [vmem:[%s472_s28] sm:$0xff] %v1511_v15  }
 0x3c4   : > { %v1725_v16 = vpop.eup %1724 }
 0x3c5   : > { %v1727_v17 = vpop.eup %1726 }
 0x3c6   : > { %v1729_v18 = vpop.eup %1728 }
 0x3c7   : > { %v1731_v19 = vpop.eup %1730  ;;  %v1526_v20 = vpack.c.bf16 %v1729_v18, %v1725_v16 }
 0x3c8   : > { %v1521_v21 = vpack.c.bf16 %v1731_v19, %v1727_v17 }
 0x3c9   : > { %1533 = vst [vmem:[%s472_s28 + $0x18] sm:$0xff] %v1526_v20  }
 0x3ca   : > { %1532 = vst [vmem:[%s472_s28 + $0x10] sm:$0xff] %v1521_v21  }
 0x3cb   : > { %1773 = shalt.err (!%p1770_p9)
}
 0x3cc   : > { %s1774_s17 = scalar_lea.hbm %s2096_s18, 512  ;;  %s1778_s1 = scalar_lea.hbm %s2156_s14, 1024 }
 0x3cd   : > { %p1775_p10 = scmp.ne.s32.totalorder %s2096_s18, %s1774_s17  ;;  %p1779_p13 = scmp.lt.u32.totalorder %s2096_s18, %s2156_s14 }
 0x3ce   : > { %p1780_p0 = scmp.lt.u32.totalorder %s1778_s1, %s1774_s17  ;;  %p1782_p2 = scmp.lt.u32.totalorder %s1774_s17, %s2096_s18 }
 0x3cf   : > { %p1776_p11 = pnand %p1775_p10, %p1945_p5 }
 0x3d0   : > { %p1781_p1 = por %p1780_p0, %p1779_p13 }
 0x3d1   : > { %p1777_p12 = pneg %p1776_p11 }
 0x3d2   : > { %p1783_p3 = por %p1782_p2, %p1781_p1 }
 0x3d4   : > { %p1784_p4 = pnand %p1783_p3, %p1777_p12 }
 0x3d6   : > { %1787 = shalt.err (!%p1784_p4)
}
 0x3d7   : > { %s2175_s2 = smov 4   ;;  %s2176_s20 = smov 64  }
 0x3d8   : > { %1643 = dma.vmem_to_hbm [thread:$0]  (%p1945_p5), %s2089_s22, 512, %s2096_s18, %s1265_s25, %s2176_s20, %s2176_s20, %s2175_s2  }
 0x3d9 PF: > { %p1653_p7 = scmp.ge.s32.totalorder %s1826_s16, 2  ;;  %s1309_s15 = sand.u32 1, %s1814_s29  }
 0x3da   : > { %s1310_s17 = scalar_lea.sflag [#allocation3], %s1309_s15 }
 0x3db   : > { %p1647_p8 = pnand %p1653_p7, %p1949_p6 }
 0x3dd   : > { %1805 = dma.done.wait (!%p1647_p8), %s1310_s17, 512  }
 0x3de   : > { %1807 = vsyncadd (!%p1647_p8), %s1310_s17, 4294966784  ;;  %s1319_s23 = scalar_lea.sflag [#allocation5], %s1309_s15 }
 0x3df   : > { %1809 = dma.done.wait (!%p1647_p8), %s1319_s23, 512  }
 0x3e0   : > { %1811 = vsyncadd (!%p1647_p8), %s1319_s23, 4294966784  ;;  %s2177_s21 = sld [smem:[#allocation8_spill]]  ;;  %s2178_s15 = sld [smem:[#allocation9_spill]] }
 0x3e1   : > { %p28_p5 = scmp.ge.s32.totalorder %s1932_s19, 4   ;;  %s2179_s29 = smov %s1818_s30 }
 0x3e2   : > { %s2181_s16 = smov %s1932_s19 }
 0x3e3   :  { %30 = sbr.rel (!%p28_p5) target bundleno = 9 (0x9), region = 124 }
 0x3e6   : > { %s2180_s30 = smov %s2177_s21 }
 0x3ea   :  { %1324 = vsyncpa [#allocation3], 1 }
 0x3eb   :  { %1326 = vsyncpa [#allocation3 + $0x1], 1 }
 0x3ec   :  { %1327 = vsyncpa [#allocation5], 1 }
 0x3ed   :  { %1329 = vsyncpa [#allocation5 + $0x1], 1 }

</bundles_post_ra>
